<compile_context>
chip_gen: v7x
topology: tpu7x:2x2x1
jax: 0.10.0
libtpu: 0.0.40
codegen_flags: <defaults>
</compile_context>

<pallas_src>
import jax
import jax.numpy as jnp
from jax.experimental import pallas as pl
from jax.experimental.pallas import tpu as pltpu

_LANE = 128
_MAX_CHUNKS = 32          # cap on unrolled 128-lane chunks per grid step


def _sublane_packing(dtype) -> int:
    """Native sublane packing for a dtype: f32 -> 8, bf16 -> 16, int8/bool -> 32."""
    return max(8, 32 // jnp.dtype(dtype).itemsize)


def _round_up(x: int, m: int) -> int:
    return ((x + m - 1) // m) * m


def _vmem_capacity_bytes() -> int:
    try:
        return int(pltpu.get_tpu_info().vmem_capacity_bytes)
    except Exception:
        return 64 * 1024 * 1024            # v7x-sized conservative fallback


def _pick_lane_tile(l_min: int, t_max: int) -> int:
    """Largest multiple-of-128 divisor of l_min (itself a multiple of 128) <= t_max."""
    best = _LANE
    t = _LANE
    while t <= min(l_min, t_max):
        if l_min % t == 0:
            best = t
        t += _LANE
    return best


def _make_std_kernel(nchunks: int):
    def kernel(y_ref, g_ref, m_ref, o_l, o_ml, o_ml2, o_m,
               acc_l, acc_ml, acc_ml2, acc_m):
        t = pl.program_id(2)

        @pl.when(t == 0)
        def _():
            acc_l[...] = jnp.zeros_like(acc_l)
            acc_ml[...] = jnp.zeros_like(acc_ml)
            acc_ml2[...] = jnp.zeros_like(acc_ml2)
            acc_m[...] = jnp.zeros_like(acc_m)

        # Stream the tile 128 lanes at a time; accumulate with pure VPU adds
        # into wide (C, S, 128) f32 scratch.  No XLU work per tile.
        for j in range(nchunks):
            sl = pl.ds(j * _LANE, _LANE)
            mj = m_ref[:, :, sl].astype(jnp.float32)          # int8/bool -> f32 here
            dj = (y_ref[:, :, sl].astype(jnp.float32)
                  - g_ref[:, :, sl].astype(jnp.float32)) * mj  # (y-g)*m == y*m - g*m
            mdj = mj * dj
            acc_l[...] += dj                                   # sum loss
            acc_ml[...] += mdj                                 # sum m*loss
            acc_ml2[...] += mdj * dj                           # sum m*loss^2
            acc_m[...] += mj                                   # sum m

        @pl.when(t == pl.num_programs(2) - 1)
        def _():
            def collapse(acc):            # (C, S, 128) -> (C, 1, 1), single XLU pass
                return jnp.sum(jnp.sum(acc[...], axis=1, keepdims=True),
                               axis=2, keepdims=True)
            o_l[...] = collapse(acc_l)
            o_ml[...] = collapse(acc_ml)
            o_ml2[...] = collapse(acc_ml2)
            o_m[...] = collapse(acc_m)

    return kernel


def std_forward(y_hat, g_truth, mask, *, target_block_bytes=None):
    """Std.forward: y_hat/g_truth/mask of shape (B, C, H, W) -> (C,) float32.

    Inputs are streamed in their native dtypes (mask ideally int8/bool);
    all math is done in f32 inside the kernel.
    """
    B, C, H, W = y_hat.shape
    assert g_truth.shape == y_hat.shape and mask.shape == y_hat.shape
    HW = H * W

    # Bool masks are already 1 byte; int8 keeps the load path simple.
    if mask.dtype == jnp.bool_:
        mask = mask.astype(jnp.int8)

    # Sublane fold: satisfy the strictest native packing among the streamed dtypes.
    S = max(_sublane_packing(y_hat.dtype), _sublane_packing(g_truth.dtype),
            _sublane_packing(mask.dtype))
    bytes_per_elem = (jnp.dtype(y_hat.dtype).itemsize
                      + jnp.dtype(g_truth.dtype).itemsize
                      + jnp.dtype(mask.dtype).itemsize)

    # Generation-aware VMEM budget (v7x: 64 MiB physical, v5e/v6e: 128 MiB).
    vmem_cap = _vmem_capacity_bytes()
    vmem_limit = int(min(max(vmem_cap // 2, 32 * 1024 * 1024), 64 * 1024 * 1024))
    if target_block_bytes is None:
        target_block_bytes = vmem_limit // 8   # 3 inputs x 2 buffers stay far below limit

    rows = C * S
    t_budget = max(_LANE,
                   (target_block_bytes // (bytes_per_elem * rows)) // _LANE * _LANE)
    t_max = min(t_budget, _MAX_CHUNKS * _LANE)

    # Minimal zero-padded lane extent; padding is exact (mask==0 contributes 0).
    l_min = _round_up(-(-HW // S), _LANE)
    T = _pick_lane_tile(l_min, t_max)
    num_t = l_min // T

    # 2-way spatial split so small/odd batches still use both v7x TensorCores.
    n_splits = 2 if (B % 2 == 1 and num_t >= 2) else 1
    if n_splits == 2 and num_t % 2 == 1:
        num_t += 1                             # pad one extra all-zero tile
    tps = num_t // n_splits

    L = T * num_t
    HW_pad = S * L

    def prep(x):
        x = x.reshape(B, C, HW)
        if HW_pad != HW:
            x = jnp.pad(x, ((0, 0), (0, 0), (0, HW_pad - HW)))
        return x.reshape(B, C, S, L)

    y, g, m = prep(y_hat), prep(g_truth), prep(mask)

    def in_spec():
        return pl.BlockSpec((None, C, S, T), lambda p, b, t: (b, 0, 0, p * tps + t))

    def out_spec():
        return pl.BlockSpec((None, None, C, 1, 1), lambda p, b, t: (p, b, 0, 0, 0))

    part_shape = jax.ShapeDtypeStruct((n_splits, B, C, 1, 1), jnp.float32)

    cost = pl.CostEstimate(
        flops=int(8 * B * C * HW_pad),
        transcendentals=0,
        bytes_accessed=int(B * C * HW_pad * bytes_per_elem + 4 * n_splits * B * C * 4),
    )

    parts = pl.pallas_call(
        _make_std_kernel(T // _LANE),
        out_shape=(part_shape,) * 4,
        grid_spec=pltpu.PrefetchScalarGridSpec(
            num_scalar_prefetch=0,
            grid=(n_splits, B, tps),           # reduction axis last
            in_specs=[in_spec(), in_spec(), in_spec()],
            out_specs=[out_spec() for _ in range(4)],
            scratch_shapes=[pltpu.VMEM((C, S, _LANE), jnp.float32)] * 4,
        ),
        compiler_params=pltpu.CompilerParams(
            dimension_semantics=("parallel", "parallel", "arbitrary"),
            vmem_limit_bytes=vmem_limit,
        ),
        cost_estimate=cost,
    )(y, g, m)

    # O(B*C) finalize in plain JAX: combine split partials, then mean/var/sqrt/batch-mean.
    s_l, s_ml, s_ml2, s_m = (p.reshape(n_splits, B, C).sum(axis=0) for p in parts)
    predot = jnp.sum(s_m, axis=1, keepdims=True)    # (B, 1): sum(mask over C,H,W)
    inv = 1.0 / predot                              # NaN/inf for all-zero mask, like PyTorch
    mean = s_l * inv                                # (B, C)
    # TODO(synk): single-pass variance can cancel in f32 when |mean| >> std on very
    # large images; switch to a second spatial pass if that tolerance ever matters.
    var = (s_ml2 - 2.0 * mean * s_ml + mean * mean * s_m) * inv
    std = jnp.sqrt(jnp.maximum(var, 0.0))
    return jnp.mean(std, axis=0)                    # (C,)


def std_reference(y_hat, g_truth, mask):
    y = y_hat * mask
    g = g_truth * mask
    predot = jnp.sum(mask, axis=(1, 2, 3)).reshape(mask.shape[0], 1, 1, 1)
    loss = y - g
    mean = jnp.sum(loss, axis=(2, 3), keepdims=True) / predot
    para1 = ((loss - mean) ** 2) * mask
    para2 = jnp.sqrt(jnp.sum(para1, axis=(2, 3), keepdims=True) / predot)
    return jnp.mean(para2, axis=0).reshape(y_hat.shape[1])


if __name__ == "__main__":
    key = jax.random.PRNGKey(0)
    k1, k2, k3, k4, k5, k6 = jax.random.split(key, 6)

    # Check 1: f32 predictions + int8 binary mask (B=2 -> no spatial split).
    B, C, H, W = 2, 4, 16, 16
    y_hat = jax.random.normal(k1, (B, C, H, W), dtype=jnp.float32)
    g_truth = jax.random.normal(k2, (B, C, H, W), dtype=jnp.float32)
    mask = (jax.random.uniform(k3, (B, C, H, W)) > 0.3).astype(jnp.int8)

    out = jax.block_until_ready(std_forward(y_hat, g_truth, mask))
    ref = std_reference(y_hat, g_truth, mask.astype(jnp.float32))
    assert out.shape == (C,)
    assert jnp.allclose(out, ref, rtol=1e-5, atol=1e-5), (out, ref)

    # Check 2: bf16 predictions, B=1 (exercises the 2-way spatial-split parallel
    # grid axis); small target_block_bytes forces multiple spatial tiles.
    B2, C2, H2, W2 = 1, 4, 96, 96
    y2 = jax.random.normal(k4, (B2, C2, H2, W2), dtype=jnp.bfloat16)
    g2 = jax.random.normal(k5, (B2, C2, H2, W2), dtype=jnp.bfloat16)
    m2 = (jax.random.uniform(k6, (B2, C2, H2, W2)) > 0.5).astype(jnp.int8)

    out2 = jax.block_until_ready(
        std_forward(y2, g2, m2, target_block_bytes=64 * 1024))
    ref2 = std_reference(y2.astype(jnp.float32), g2.astype(jnp.float32),
                         m2.astype(jnp.float32))
    assert out2.shape == (C2,)
    assert jnp.allclose(out2, ref2, rtol=1e-4, atol=1e-5), (out2, ref2)

    print("KERNEL_OK")
</pallas_src>

<mosaic_0001>
module attributes {stable_mosaic.version = 11 : i64} {
  func.func @kernel(%arg0: i32, %arg1: i32, %arg2: i32, %arg3: memref<1x4x32x128xf32, #tpu.memory_space<vmem>>, %arg4: memref<1x4x32x128xf32, #tpu.memory_space<vmem>>, %arg5: memref<1x4x32x128xi8, #tpu.memory_space<vmem>>, %arg6: memref<1x1x4x1x1xf32, #tpu.memory_space<vmem>>, %arg7: memref<1x1x4x1x1xf32, #tpu.memory_space<vmem>>, %arg8: memref<1x1x4x1x1xf32, #tpu.memory_space<vmem>>, %arg9: memref<1x1x4x1x1xf32, #tpu.memory_space<vmem>>, %arg10: memref<4x32x128xf32, #tpu.memory_space<vmem>>, %arg11: memref<4x32x128xf32, #tpu.memory_space<vmem>>, %arg12: memref<4x32x128xf32, #tpu.memory_space<vmem>>, %arg13: memref<4x32x128xf32, #tpu.memory_space<vmem>>) attributes {dimension_semantics = [#tpu.dimension_semantics<parallel>, #tpu.dimension_semantics<parallel>, #tpu.dimension_semantics<arbitrary>], iteration_bounds = array<i64: 1, 2, 1>, scalar_prefetch = 0 : i64, scratch_operands = 4 : i64, tpu.core_type = #tpu.core_type<tc>, window_params = [{transform_indices = @transform_0, window_bounds = array<i64: 1, 4, 32, 128>}, {transform_indices = @transform_1, window_bounds = array<i64: 1, 4, 32, 128>}, {transform_indices = @transform_2, window_bounds = array<i64: 1, 4, 32, 128>}, {transform_indices = @transform_3, window_bounds = array<i64: 1, 1, 4, 1, 1>}, {transform_indices = @transform_4, window_bounds = array<i64: 1, 1, 4, 1, 1>}, {transform_indices = @transform_5, window_bounds = array<i64: 1, 1, 4, 1, 1>}, {transform_indices = @transform_6, window_bounds = array<i64: 1, 1, 4, 1, 1>}]} {
    %c0_i32 = arith.constant 0 : i32
    %0 = arith.cmpi eq, %arg2, %c0_i32 : i32
    %1 = arith.extui %0 : i1 to i32
    %c0_i32_0 = arith.constant 0 : i32
    %2 = arith.cmpi ne, %1, %c0_i32_0 : i32
    scf.if %2 {
      %cst = arith.constant 0.000000e+00 : f32
      %29 = vector.broadcast %cst : f32 to vector<4x32x128xf32>
      %c0_38 = arith.constant 0 : index
      %c0_39 = arith.constant 0 : index
      %c0_40 = arith.constant 0 : index
      %30 = vector.load %arg10[%c0_38, %c0_39, %c0_40] : memref<4x32x128xf32, #tpu.memory_space<vmem>>, vector<4x32x128xf32>
      tpu.vector_store %arg10[%c0_38, %c0_39, %c0_40], %29 {strides = array<i32>} : memref<4x32x128xf32, #tpu.memory_space<vmem>>, vector<4x32x128xf32>,
      %cst_41 = arith.constant 0.000000e+00 : f32
      %31 = vector.broadcast %cst_41 : f32 to vector<4x32x128xf32>
      %c0_42 = arith.constant 0 : index
      %c0_43 = arith.constant 0 : index
      %c0_44 = arith.constant 0 : index
      %32 = vector.load %arg11[%c0_42, %c0_43, %c0_44] : memref<4x32x128xf32, #tpu.memory_space<vmem>>, vector<4x32x128xf32>
      tpu.vector_store %arg11[%c0_42, %c0_43, %c0_44], %31 {strides = array<i32>} : memref<4x32x128xf32, #tpu.memory_space<vmem>>, vector<4x32x128xf32>,
      %cst_45 = arith.constant 0.000000e+00 : f32
      %33 = vector.broadcast %cst_45 : f32 to vector<4x32x128xf32>
      %c0_46 = arith.constant 0 : index
      %c0_47 = arith.constant 0 : index
      %c0_48 = arith.constant 0 : index
      %34 = vector.load %arg12[%c0_46, %c0_47, %c0_48] : memref<4x32x128xf32, #tpu.memory_space<vmem>>, vector<4x32x128xf32>
      tpu.vector_store %arg12[%c0_46, %c0_47, %c0_48], %33 {strides = array<i32>} : memref<4x32x128xf32, #tpu.memory_space<vmem>>, vector<4x32x128xf32>,
      %cst_49 = arith.constant 0.000000e+00 : f32
      %35 = vector.broadcast %cst_49 : f32 to vector<4x32x128xf32>
      %c0_50 = arith.constant 0 : index
      %c0_51 = arith.constant 0 : index
      %c0_52 = arith.constant 0 : index
      %36 = vector.load %arg13[%c0_50, %c0_51, %c0_52] : memref<4x32x128xf32, #tpu.memory_space<vmem>>, vector<4x32x128xf32>
      tpu.vector_store %arg13[%c0_50, %c0_51, %c0_52], %35 {strides = array<i32>} : memref<4x32x128xf32, #tpu.memory_space<vmem>>, vector<4x32x128xf32>,
    } else {
    }
    %c0 = arith.constant 0 : index
    %c0_1 = arith.constant 0 : index
    %c0_2 = arith.constant 0 : index
    %c0_3 = arith.constant 0 : index
    %3 = vector.load %arg5[%c0, %c0_1, %c0_2, %c0_3] : memref<1x4x32x128xi8, #tpu.memory_space<vmem>>, vector<1x4x32x128xi8>
    %4 = vector.shape_cast %3 : vector<1x4x32x128xi8> to vector<4x32x128xi8>
    %5 = arith.sitofp %4 : vector<4x32x128xi8> to vector<4x32x128xf32>
    %c0_4 = arith.constant 0 : index
    %c0_5 = arith.constant 0 : index
    %c0_6 = arith.constant 0 : index
    %c0_7 = arith.constant 0 : index
    %6 = vector.load %arg3[%c0_4, %c0_5, %c0_6, %c0_7] : memref<1x4x32x128xf32, #tpu.memory_space<vmem>>, vector<1x4x32x128xf32>
    %7 = vector.shape_cast %6 : vector<1x4x32x128xf32> to vector<4x32x128xf32>
    %c0_8 = arith.constant 0 : index
    %c0_9 = arith.constant 0 : index
    %c0_10 = arith.constant 0 : index
    %c0_11 = arith.constant 0 : index
    %8 = vector.load %arg4[%c0_8, %c0_9, %c0_10, %c0_11] : memref<1x4x32x128xf32, #tpu.memory_space<vmem>>, vector<1x4x32x128xf32>
    %9 = vector.shape_cast %8 : vector<1x4x32x128xf32> to vector<4x32x128xf32>
    %10 = arith.subf %7, %9 : vector<4x32x128xf32>
    %11 = arith.mulf %10, %5 : vector<4x32x128xf32>
    %12 = arith.mulf %5, %11 : vector<4x32x128xf32>
    %c0_12 = arith.constant 0 : index
    %c0_13 = arith.constant 0 : index
    %c0_14 = arith.constant 0 : index
    %13 = vector.load %arg10[%c0_12, %c0_13, %c0_14] : memref<4x32x128xf32, #tpu.memory_space<vmem>>, vector<4x32x128xf32>
    %14 = arith.addf %13, %11 : vector<4x32x128xf32>
    %c0_15 = arith.constant 0 : index
    %c0_16 = arith.constant 0 : index
    %c0_17 = arith.constant 0 : index
    %15 = vector.load %arg10[%c0_15, %c0_16, %c0_17] : memref<4x32x128xf32, #tpu.memory_space<vmem>>, vector<4x32x128xf32>
    tpu.vector_store %arg10[%c0_15, %c0_16, %c0_17], %14 {strides = array<i32>} : memref<4x32x128xf32, #tpu.memory_space<vmem>>, vector<4x32x128xf32>,
    %c0_18 = arith.constant 0 : index
    %c0_19 = arith.constant 0 : index
    %c0_20 = arith.constant 0 : index
    %16 = vector.load %arg11[%c0_18, %c0_19, %c0_20] : memref<4x32x128xf32, #tpu.memory_space<vmem>>, vector<4x32x128xf32>
    %17 = arith.addf %16, %12 : vector<4x32x128xf32>
    %c0_21 = arith.constant 0 : index
    %c0_22 = arith.constant 0 : index
    %c0_23 = arith.constant 0 : index
    %18 = vector.load %arg11[%c0_21, %c0_22, %c0_23] : memref<4x32x128xf32, #tpu.memory_space<vmem>>, vector<4x32x128xf32>
    tpu.vector_store %arg11[%c0_21, %c0_22, %c0_23], %17 {strides = array<i32>} : memref<4x32x128xf32, #tpu.memory_space<vmem>>, vector<4x32x128xf32>,
    %c0_24 = arith.constant 0 : index
    %c0_25 = arith.constant 0 : index
    %c0_26 = arith.constant 0 : index
    %19 = vector.load %arg12[%c0_24, %c0_25, %c0_26] : memref<4x32x128xf32, #tpu.memory_space<vmem>>, vector<4x32x128xf32>
    %20 = arith.mulf %12, %11 : vector<4x32x128xf32>
    %21 = arith.addf %19, %20 : vector<4x32x128xf32>
    %c0_27 = arith.constant 0 : index
    %c0_28 = arith.constant 0 : index
    %c0_29 = arith.constant 0 : index
    %22 = vector.load %arg12[%c0_27, %c0_28, %c0_29] : memref<4x32x128xf32, #tpu.memory_space<vmem>>, vector<4x32x128xf32>
    tpu.vector_store %arg12[%c0_27, %c0_28, %c0_29], %21 {strides = array<i32>} : memref<4x32x128xf32, #tpu.memory_space<vmem>>, vector<4x32x128xf32>,
    %c0_30 = arith.constant 0 : index
    %c0_31 = arith.constant 0 : index
    %c0_32 = arith.constant 0 : index
    %23 = vector.load %arg13[%c0_30, %c0_31, %c0_32] : memref<4x32x128xf32, #tpu.memory_space<vmem>>, vector<4x32x128xf32>
    %24 = arith.addf %23, %5 : vector<4x32x128xf32>
    %c0_33 = arith.constant 0 : index
    %c0_34 = arith.constant 0 : index
    %c0_35 = arith.constant 0 : index
    %25 = vector.load %arg13[%c0_33, %c0_34, %c0_35] : memref<4x32x128xf32, #tpu.memory_space<vmem>>, vector<4x32x128xf32>
    tpu.vector_store %arg13[%c0_33, %c0_34, %c0_35], %24 {strides = array<i32>} : memref<4x32x128xf32, #tpu.memory_space<vmem>>, vector<4x32x128xf32>,
    %c0_i32_36 = arith.constant 0 : i32
    %26 = arith.cmpi eq, %arg2, %c0_i32_36 : i32
    %27 = arith.extui %26 : i1 to i32
    %c0_i32_37 = arith.constant 0 : i32
    %28 = arith.cmpi ne, %27, %c0_i32_37 : i32
    scf.if %28 {
      %c0_38 = arith.constant 0 : index
      %c0_39 = arith.constant 0 : index
      %c0_40 = arith.constant 0 : index
      %29 = vector.load %arg10[%c0_38, %c0_39, %c0_40] : memref<4x32x128xf32, #tpu.memory_space<vmem>>, vector<4x32x128xf32>
      %cst = arith.constant dense<0.000000e+00> : vector<4x128xf32>
      %30 = vector.multi_reduction <add>, %29, %cst [1] : vector<4x32x128xf32> to vector<4x128xf32>
      %31 = vector.shape_cast %30 : vector<4x128xf32> to vector<4x1x128xf32>
      %cst_41 = arith.constant dense<0.000000e+00> : vector<4x1xf32>
      %32 = vector.multi_reduction <add>, %31, %cst_41 [2] : vector<4x1x128xf32> to vector<4x1xf32>
      %33 = vector.shape_cast %32 : vector<4x1xf32> to vector<4x1x1xf32>
      %c0_42 = arith.constant 0 : index
      %c0_43 = arith.constant 0 : index
      %c0_44 = arith.constant 0 : index
      %c0_45 = arith.constant 0 : index
      %c0_46 = arith.constant 0 : index
      %34 = vector.load %arg6[%c0_42, %c0_43, %c0_44, %c0_45, %c0_46] : memref<1x1x4x1x1xf32, #tpu.memory_space<vmem>>, vector<1x1x4x1x1xf32>
      %35 = vector.shape_cast %34 : vector<1x1x4x1x1xf32> to vector<4x1x1xf32>
      %36 = vector.shape_cast %33 : vector<4x1x1xf32> to vector<1x1x4x1x1xf32>
      tpu.vector_store %arg6[%c0_42, %c0_43, %c0_44, %c0_45, %c0_46], %36 {strides = array<i32>} : memref<1x1x4x1x1xf32, #tpu.memory_space<vmem>>, vector<1x1x4x1x1xf32>,
      %c0_47 = arith.constant 0 : index
      %c0_48 = arith.constant 0 : index
      %c0_49 = arith.constant 0 : index
      %37 = vector.load %arg11[%c0_47, %c0_48, %c0_49] : memref<4x32x128xf32, #tpu.memory_space<vmem>>, vector<4x32x128xf32>
      %cst_50 = arith.constant dense<0.000000e+00> : vector<4x128xf32>
      %38 = vector.multi_reduction <add>, %37, %cst_50 [1] : vector<4x32x128xf32> to vector<4x128xf32>
      %39 = vector.shape_cast %38 : vector<4x128xf32> to vector<4x1x128xf32>
      %cst_51 = arith.constant dense<0.000000e+00> : vector<4x1xf32>
      %40 = vector.multi_reduction <add>, %39, %cst_51 [2] : vector<4x1x128xf32> to vector<4x1xf32>
      %41 = vector.shape_cast %40 : vector<4x1xf32> to vector<4x1x1xf32>
      %c0_52 = arith.constant 0 : index
      %c0_53 = arith.constant 0 : index
      %c0_54 = arith.constant 0 : index
      %c0_55 = arith.constant 0 : index
      %c0_56 = arith.constant 0 : index
      %42 = vector.load %arg7[%c0_52, %c0_53, %c0_54, %c0_55, %c0_56] : memref<1x1x4x1x1xf32, #tpu.memory_space<vmem>>, vector<1x1x4x1x1xf32>
      %43 = vector.shape_cast %42 : vector<1x1x4x1x1xf32> to vector<4x1x1xf32>
      %44 = vector.shape_cast %41 : vector<4x1x1xf32> to vector<1x1x4x1x1xf32>
      tpu.vector_store %arg7[%c0_52, %c0_53, %c0_54, %c0_55, %c0_56], %44 {strides = array<i32>} : memref<1x1x4x1x1xf32, #tpu.memory_space<vmem>>, vector<1x1x4x1x1xf32>,
      %c0_57 = arith.constant 0 : index
      %c0_58 = arith.constant 0 : index
      %c0_59 = arith.constant 0 : index
      %45 = vector.load %arg12[%c0_57, %c0_58, %c0_59] : memref<4x32x128xf32, #tpu.memory_space<vmem>>, vector<4x32x128xf32>
      %cst_60 = arith.constant dense<0.000000e+00> : vector<4x128xf32>
      %46 = vector.multi_reduction <add>, %45, %cst_60 [1] : vector<4x32x128xf32> to vector<4x128xf32>
      %47 = vector.shape_cast %46 : vector<4x128xf32> to vector<4x1x128xf32>
      %cst_61 = arith.constant dense<0.000000e+00> : vector<4x1xf32>
      %48 = vector.multi_reduction <add>, %47, %cst_61 [2] : vector<4x1x128xf32> to vector<4x1xf32>
      %49 = vector.shape_cast %48 : vector<4x1xf32> to vector<4x1x1xf32>
      %c0_62 = arith.constant 0 : index
      %c0_63 = arith.constant 0 : index
      %c0_64 = arith.constant 0 : index
      %c0_65 = arith.constant 0 : index
      %c0_66 = arith.constant 0 : index
      %50 = vector.load %arg8[%c0_62, %c0_63, %c0_64, %c0_65, %c0_66] : memref<1x1x4x1x1xf32, #tpu.memory_space<vmem>>, vector<1x1x4x1x1xf32>
      %51 = vector.shape_cast %50 : vector<1x1x4x1x1xf32> to vector<4x1x1xf32>
      %52 = vector.shape_cast %49 : vector<4x1x1xf32> to vector<1x1x4x1x1xf32>
      tpu.vector_store %arg8[%c0_62, %c0_63, %c0_64, %c0_65, %c0_66], %52 {strides = array<i32>} : memref<1x1x4x1x1xf32, #tpu.memory_space<vmem>>, vector<1x1x4x1x1xf32>,
      %c0_67 = arith.constant 0 : index
      %c0_68 = arith.constant 0 : index
      %c0_69 = arith.constant 0 : index
      %53 = vector.load %arg13[%c0_67, %c0_68, %c0_69] : memref<4x32x128xf32, #tpu.memory_space<vmem>>, vector<4x32x128xf32>
      %cst_70 = arith.constant dense<0.000000e+00> : vector<4x128xf32>
      %54 = vector.multi_reduction <add>, %53, %cst_70 [1] : vector<4x32x128xf32> to vector<4x128xf32>
      %55 = vector.shape_cast %54 : vector<4x128xf32> to vector<4x1x128xf32>
      %cst_71 = arith.constant dense<0.000000e+00> : vector<4x1xf32>
      %56 = vector.multi_reduction <add>, %55, %cst_71 [2] : vector<4x1x128xf32> to vector<4x1xf32>
      %57 = vector.shape_cast %56 : vector<4x1xf32> to vector<4x1x1xf32>
      %c0_72 = arith.constant 0 : index
      %c0_73 = arith.constant 0 : index
      %c0_74 = arith.constant 0 : index
      %c0_75 = arith.constant 0 : index
      %c0_76 = arith.constant 0 : index
      %58 = vector.load %arg9[%c0_72, %c0_73, %c0_74, %c0_75, %c0_76] : memref<1x1x4x1x1xf32, #tpu.memory_space<vmem>>, vector<1x1x4x1x1xf32>
      %59 = vector.shape_cast %58 : vector<1x1x4x1x1xf32> to vector<4x1x1xf32>
      %60 = vector.shape_cast %57 : vector<4x1x1xf32> to vector<1x1x4x1x1xf32>
      tpu.vector_store %arg9[%c0_72, %c0_73, %c0_74, %c0_75, %c0_76], %60 {strides = array<i32>} : memref<1x1x4x1x1xf32, #tpu.memory_space<vmem>>, vector<1x1x4x1x1xf32>,
    } else {
    }
    return
  }
  func.func @transform_0(%arg0: i32, %arg1: i32, %arg2: i32) -> (i32, i32, i32, i32) {
    %c1_i32 = arith.constant 1 : i32
    %0 = arith.muli %arg0, %c1_i32 : i32
    %1 = arith.addi %0, %arg2 : i32
    %c0_i32 = arith.constant 0 : i32
    %c0_i32_0 = arith.constant 0 : i32
    %c0_i32_1 = arith.constant 0 : i32
    return %arg1, %c0_i32, %c0_i32_0, %1 : i32, i32, i32, i32
  }
  func.func @transform_1(%arg0: i32, %arg1: i32, %arg2: i32) -> (i32, i32, i32, i32) {
    %c1_i32 = arith.constant 1 : i32
    %0 = arith.muli %arg0, %c1_i32 : i32
    %1 = arith.addi %0, %arg2 : i32
    %c0_i32 = arith.constant 0 : i32
    %c0_i32_0 = arith.constant 0 : i32
    %c0_i32_1 = arith.constant 0 : i32
    return %arg1, %c0_i32, %c0_i32_0, %1 : i32, i32, i32, i32
  }
  func.func @transform_2(%arg0: i32, %arg1: i32, %arg2: i32) -> (i32, i32, i32, i32) {
    %c1_i32 = arith.constant 1 : i32
    %0 = arith.muli %arg0, %c1_i32 : i32
    %1 = arith.addi %0, %arg2 : i32
    %c0_i32 = arith.constant 0 : i32
    %c0_i32_0 = arith.constant 0 : i32
    %c0_i32_1 = arith.constant 0 : i32
    return %arg1, %c0_i32, %c0_i32_0, %1 : i32, i32, i32, i32
  }
  func.func @transform_3(%arg0: i32, %arg1: i32, %arg2: i32) -> (i32, i32, i32, i32, i32) {
    %c0_i32 = arith.constant 0 : i32
    %c0_i32_0 = arith.constant 0 : i32
    %c0_i32_1 = arith.constant 0 : i32
    %c0_i32_2 = arith.constant 0 : i32
    return %arg0, %arg1, %c0_i32, %c0_i32_0, %c0_i32_1 : i32, i32, i32, i32, i32
  }
  func.func @transform_4(%arg0: i32, %arg1: i32, %arg2: i32) -> (i32, i32, i32, i32, i32) {
    %c0_i32 = arith.constant 0 : i32
    %c0_i32_0 = arith.constant 0 : i32
    %c0_i32_1 = arith.constant 0 : i32
    %c0_i32_2 = arith.constant 0 : i32
    return %arg0, %arg1, %c0_i32, %c0_i32_0, %c0_i32_1 : i32, i32, i32, i32, i32
  }
  func.func @transform_5(%arg0: i32, %arg1: i32, %arg2: i32) -> (i32, i32, i32, i32, i32) {
    %c0_i32 = arith.constant 0 : i32
    %c0_i32_0 = arith.constant 0 : i32
    %c0_i32_1 = arith.constant 0 : i32
    %c0_i32_2 = arith.constant 0 : i32
    return %arg0, %arg1, %c0_i32, %c0_i32_0, %c0_i32_1 : i32, i32, i32, i32, i32
  }
  func.func @transform_6(%arg0: i32, %arg1: i32, %arg2: i32) -> (i32, i32, i32, i32, i32) {
    %c0_i32 = arith.constant 0 : i32
    %c0_i32_0 = arith.constant 0 : i32
    %c0_i32_1 = arith.constant 0 : i32
    %c0_i32_2 = arith.constant 0 : i32
    return %arg0, %arg1, %c0_i32, %c0_i32_0, %c0_i32_1 : i32, i32, i32, i32, i32
  }
}

</mosaic_0001>

<bundles_post_ra>
// kernel: tpu_custom_call.1
= control target key start
LH: loop header
LB: loop body
LE: loop exit
PB: predicated region body
PF: predicated region fallthrough
CT: control target
= control target key end

     0   :  { %s2136_s0 = inlined_call_operand.hbm [shape: f32[2,4,32,128], index: 0, kind: input, shape index: {}]   ;;  %s2137_s1 = inlined_call_operand.hbm [shape: f32[2,4,32,128], index: 1, kind: input, shape index: {}]   ;;  %s2138_s2 = inlined_call_operand.hbm [shape: s8[2,4,32,128], index: 2, kind: input, shape index: {}]   ;;  %s2139_s3 = inlined_call_operand.vmem [shape: f32[1,2,4,1,1], index: 3, kind: output, shape index: {0}]   ;;  %s2140_s4 = inlined_call_operand.vmem [shape: f32[1,2,4,1,1], index: 4, kind: output, shape index: {1}]   ;;  %s2141_s5 = inlined_call_operand.vmem [shape: f32[1,2,4,1,1], index: 5, kind: output, shape index: {2}]   ;;  %s2142_s6 = inlined_call_operand.vmem [shape: f32[1,2,4,1,1], index: 6, kind: output, shape index: {3}]  }
   0x1   :  { %2150 = sst [smem:[#allocation14_spill]] %s2136_s0 }
   0x2   :  { %2151 = sst [smem:[#allocation15_spill]] %s2137_s1 }
   0x3   :  { %12 = vsyncpa [#allocation7], 0 }
   0x4   :  { %14 = vsyncpa [#allocation7 + $0x1], 0 }
   0x5   :  { %15 = vsyncpa [#allocation9], 0 }
   0x6   :  { %17 = vsyncpa [#allocation9 + $0x1], 0  ;;  %s1674_s21 = smov 0   ;;  %s1676_s22 = smov 0  }
   0x7   :  { %s1678_s23 = smov 0   ;;  %s1680_s24 = smov 0  }
   0x8   :  { %s1682_s25 = smov 0   ;;  %s1684_s26 = smov 0  }
   0x9 LB: > { %s2144_s27 = sadd.s32 4294967295, %s1632_s26   ;;  %s38_s28 = sadd.s32 1, %s1628_s25  ;;  %s1632_s26 = sphi %s1684_s26, %s23_s26   ;;  %s1628_s25 = sphi %s1682_s25, %s2170_s25   ;;  %s1624_s24 = sphi %s1680_s24, %s2169_s24   ;;  %s1620_s23 = sphi %s1678_s23, %s2168_s23   ;;  %s1616_s22 = sphi %s1676_s22, %s2167_s22   ;;  %s1612_s21 = sphi %s1674_s21, %s2166_s21  }
   0xa   : > { %p40_p0 = scmp.ge.s32.totalorder %s38_s28, 2  ;;  %s53_s29 = sadd.s32 1, %s1620_s23 }
   0xb   : > { %p60_p1 = scmp.ne.s32.totalorder %s1620_s23, %s1616_s22  ;;  %p61_p2 = scmp.eq.s32.totalorder %s1632_s26, 0 }
   0xc   : > { %s2172_s28 = smov (%p40_p0, %s38_s28), 0  ;;  %p66_p4 = scmp.ne.s32.totalorder %s1616_s22, %s1612_s21 }
   0xd   : > { %p62_p3 = por %p61_p2, %p60_p1  ;;  %s48_s30 = ssub.s32 %s1628_s25, %s2172_s28 }
   0xe   : > { %p67_p5 = scmp.eq.s32.totalorder %s2144_s27, 0  ;;  %p51_p6 = scmp.eq.s32.totalorder %s48_s30, 0 }
   0xf   : > { %p1437_p8 = scmp.lt.s32.totalorder %s1632_s26, 2  ;;  %s1724_s9 = sand.u32 1, %s1620_s23  }
  0x10   : > { %p1715_p7 = por %p67_p5, %p66_p4  ;;  %s1418_s10 = sshll.u32 %s1628_s25, 11 }
  0x11   : > { %s1721_s8 = scalar_select %p51_p6, %s1620_s23, %s53_s29  }
  0x12   : > { %s2152_s7 = scalar_select %p1715_p7, 1, 0 }
  0x13   : > { %s1399_s11 = sshll.u32 %s1724_s9, 7  ;;  %p1728_p9 = pnand %p1437_p8, %p62_p3 }
  0x14   : > { %s285_s13 = sand.u32 1, %s1632_s26   ;;  %s2154_s1 = sld [smem:[#allocation15_spill]] }
  0x15   : > { %s289_s17 = scalar_lea.vmem [#allocation8], %s1399_s11  ;;  %s1745_s19 = scalar_lea.sflag [#allocation9], %s285_s13 }
  0x16   : > { %s298_s18 = sshll.u32 %s289_s17, 4  ;;  %p1751_p12 = pneg %p1728_p9  ;;  %s1742_s18 = int_to_ptr.vmem [resolvable:$true] %s298_s18 }
  0x1a   : > { %s1738_s16 = scalar_lea.hbm %s2154_s1, %s1418_s10  ;;  %s1493_s14 = scalar_lea.hbm %s2154_s1, 4096 }
  0x1b   : > { %s1488_s20 = scalar_lea.hbm %s1738_s16, 2048  ;;  %p1494_p1 = scmp.lt.u32.totalorder %s1738_s16, %s2154_s1 }
  0x1c   : > { %p1489_p11 = scmp.ne.s32.totalorder %s1738_s16, %s1488_s20  ;;  %p1495_p2 = scmp.lt.u32.totalorder %s1493_s14, %s1488_s20 }
  0x1d   : > { %p1497_p4 = scmp.lt.u32.totalorder %s1488_s20, %s1738_s16 }
  0x1e   : > { %p1491_p13 = pnand %p1751_p12, %p1489_p11  ;;  %p1496_p3 = por %p1495_p2, %p1494_p1 }
  0x20   : > { %p1492_p0 = pneg %p1491_p13  ;;  %p1498_p5 = por %p1497_p4, %p1496_p3 }
  0x22   : > { %p1499_p6 = pnand %p1498_p5, %p1492_p0 }
  0x24   : > { %1502 = shalt.err (!%p1499_p6)
}
  0x25   : > { %s1503_s13 = scalar_lea.vmem %s1742_s18, 2048  ;;  %s1634_s29 = smov [#allocation8]  }
  0x26   : > { %p1504_p8 = scmp.ne.s32.totalorder %s1742_s18, %s1503_s13  ;;  %s1508_s30 = sshll.u32 %s1634_s29, 4  ;;  %s1509_s30 = int_to_ptr.vmem [resolvable:$false] %s1508_s30 }
  0x27   : > { %s1510_s15 = scalar_lea.vmem %s1509_s30, 4096  ;;  %p1511_p10 = scmp.lt.s32.totalorder %s1742_s18, %s1509_s30 }
  0x28   : > { %p1506_p11 = pnand %p1504_p8, %p1751_p12  ;;  %p1512_p7 = scmp.lt.s32.totalorder %s1510_s15, %s1503_s13 }
  0x2a   : > { %p1507_p13 = pneg %p1506_p11  ;;  %p1513_p1 = por %p1512_p7, %p1511_p10 }
  0x2c   : > { %p1514_p2 = pnand %p1513_p1, %p1507_p13 }
  0x2e   : > { %1517 = shalt.err (!%p1514_p2)
}
  0x2f   : > { %s2145_s20 = smov 128   ;;  %s2147_s14 = smov 8  }
  0x30   : > { %1433 = dma.hbm_to_vmem [thread:$0]  (!%p1728_p9), %s1738_s16, 2048, %s1742_s18, %s1745_s19, %s2145_s20, %s2145_s20, %s2147_s14  }
  0x31   : > { %p329_p7 = scmp.lt.s32.totalorder %s1632_s26, 3  ;;  %p2156_p10 = scmp.ge.s32.totalorder %s1632_s26, 1 }
  0x32   : > { %s2158_s0 = sld [smem:[#allocation14_spill]]  ;;  %s266_s15 = scalar_lea.vmem [#allocation6], %s1399_s11 }
  0x33   : > { %p1781_p0 = pnand %p2156_p10, %p329_p7  ;;  %s275_s27 = sshll.u32 %s266_s15, 4  ;;  %s1794_s27 = int_to_ptr.vmem [resolvable:$true] %s275_s27 }
  0x34   : > { %s1405_s16 = sshll.u32 %s1724_s9, 5  ;;  %s263_s18 = scalar_lea.sflag [#allocation7], %s1724_s9 }
  0x35   : > { %s2157_s17 = scalar_select %p1781_p0, 1, 0 }
  0x38   : > { %s1790_s30 = scalar_lea.hbm %s2158_s0, %s1418_s10  ;;  %s1523_s10 = scalar_lea.hbm %s2158_s0, 4096 }
  0x39   : > { %s1518_s20 = scalar_lea.hbm %s1790_s30, 2048  ;;  %p1524_p6 = scmp.lt.u32.totalorder %s1790_s30, %s2158_s0 }
  0x3a   : > { %p1519_p3 = scmp.ne.s32.totalorder %s1790_s30, %s1518_s20  ;;  %p1525_p8 = scmp.lt.u32.totalorder %s1523_s10, %s1518_s20 }
  0x3b   : > { %p1527_p13 = scmp.lt.u32.totalorder %s1518_s20, %s1790_s30 }
  0x3c   : > { %p1521_p4 = pnand %p1519_p3, %p1751_p12  ;;  %p1526_p11 = por %p1525_p8, %p1524_p6 }
  0x3e   : > { %p1522_p5 = pneg %p1521_p4  ;;  %p1528_p1 = por %p1527_p13, %p1526_p11 }
  0x40   : > { %p1529_p2 = pnand %p1528_p1, %p1522_p5 }
  0x42   : > { %1532 = shalt.err (!%p1529_p2)
}
  0x43   : > { %s1533_s11 = scalar_lea.vmem %s1794_s27, 2048  ;;  %s1637_s14 = smov [#allocation6]  }
  0x44   : > { %p1534_p7 = scmp.ne.s32.totalorder %s1794_s27, %s1533_s11  ;;  %s1538_s15 = sshll.u32 %s1637_s14, 4  ;;  %s1539_s15 = int_to_ptr.vmem [resolvable:$false] %s1538_s15 }
  0x45   : > { %s1540_s1 = scalar_lea.vmem %s1539_s15, 4096  ;;  %p1541_p4 = scmp.lt.s32.totalorder %s1794_s27, %s1539_s15 }
  0x46   : > { %p1536_p10 = pnand %p1534_p7, %p1751_p12  ;;  %p1542_p0 = scmp.lt.s32.totalorder %s1540_s1, %s1533_s11 }
  0x48   : > { %p1537_p3 = pneg %p1536_p10  ;;  %p1543_p6 = por %p1542_p0, %p1541_p4 }
  0x4a   : > { %p1544_p8 = pnand %p1543_p6, %p1537_p3 }
  0x4c   : > { %1547 = shalt.err (!%p1544_p8)
}
  0x4d   : > { %s2159_s20 = smov 8   ;;  %s2160_s13 = smov 128  }
  0x4e   : > { %1430 = dma.hbm_to_vmem [thread:$0]  (!%p1728_p9), %s1790_s30, 2048, %s1794_s27, %s263_s18, %s2160_s13, %s2160_s13, %s2159_s20  }
  0x4f   : > { %s1420_s10 = sshll.u32 %s1628_s25, 9  ;;  %s312_s15 = scalar_lea.vmem [#allocation10], %s1405_s16 }
  0x50   : > { %s1828_s11 = scalar_lea.hbm %s2138_s2, %s1420_s10  ;;  %s321_s1 = sshll.u32 %s312_s15, 4  ;;  %s1832_s1 = int_to_ptr.vmem [resolvable:$true] %s321_s1 }
  0x51   : > { %s1548_s0 = scalar_lea.hbm %s1828_s11, 512  ;;  %s1553_s18 = scalar_lea.hbm %s2138_s2, 1024 }
  0x52   : > { %p1549_p0 = scmp.ne.s32.totalorder %s1828_s11, %s1548_s0  ;;  %p1554_p13 = scmp.lt.u32.totalorder %s1828_s11, %s2138_s2 }
  0x53   : > { %p1555_p1 = scmp.lt.u32.totalorder %s1553_s18, %s1548_s0  ;;  %p1557_p7 = scmp.lt.u32.totalorder %s1548_s0, %s1828_s11 }
  0x54   : > { %p1551_p5 = pnand %p1549_p0, %p1751_p12 }
  0x55   : > { %p1556_p2 = por %p1555_p1, %p1554_p13 }
  0x56   : > { %p1552_p11 = pneg %p1551_p5 }
  0x57   : > { %p1558_p10 = por %p1557_p7, %p1556_p2 }
  0x59   : > { %p1559_p3 = pnand %p1558_p10, %p1552_p11 }
  0x5b   : > { %1562 = shalt.err (!%p1559_p3)
}
  0x5c   : > { %s1563_s9 = scalar_lea.vmem %s1832_s1, 512  ;;  %s1638_s16 = smov [#allocation10]  }
  0x5d   : > { %p1564_p4 = scmp.ne.s32.totalorder %s1832_s1, %s1563_s9  ;;  %s1568_s14 = sshll.u32 %s1638_s16, 4  ;;  %s1569_s14 = int_to_ptr.vmem [resolvable:$false] %s1568_s14 }
  0x5e   : > { %s1570_s15 = scalar_lea.vmem %s1569_s14, 1024  ;;  %p1571_p0 = scmp.lt.s32.totalorder %s1832_s1, %s1569_s14 }
  0x5f   : > { %p1566_p6 = pnand %p1564_p4, %p1751_p12  ;;  %p1572_p5 = scmp.lt.s32.totalorder %s1570_s15, %s1563_s9 }
  0x61   : > { %p1567_p8 = pneg %p1566_p6  ;;  %p1573_p13 = por %p1572_p5, %p1571_p0 }
  0x63   : > { %p1574_p1 = pnand %p1573_p13, %p1567_p8 }
  0x65   : > { %1577 = shalt.err (!%p1574_p1)
}
  0x66   : > { %1436 = dma.hbm_to_vmem [thread:$0]  (!%p1728_p9), %s1828_s11, 512, %s1832_s1, %s1745_s19, %s2160_s13, %s2160_s13, %s2159_s20  }
  0x67   : > { %p2161_p12 = scmp.ne.s32.totalorder %s2157_s17, 0 }
  0x69   : > { %333 = sbr.rel (%p2161_p12) target bundleno = 336 (0x150), region = 32 }
  0x70   : > { %s335_s0 = sand.u32 1, %s1616_s22   ;;  %p2162_p11 = scmp.ne.s32.totalorder %s2152_s7, 0 }
  0x71   : > { %s1409_s21 = sshll.u32 %s335_s0, 7  ;;  %s336_s27 = scalar_lea.sflag [#allocation7], %s335_s0 }
  0x72   : > { %s1862_s30 = scalar_lea.vmem [#allocation6], %s1409_s21 }
  0x73   : > { %1603 = dma.done.wait (%p2162_p11), %s336_s27, 2048  }
  0x74   : > { %1605 = vsyncadd (%p2162_p11), %s336_s27, 4294965248  ;;  %s2163_s12 = sadd.s32 4294967295, %s1632_s26   ;;  %s1870_s20 = scalar_lea.vmem [#allocation8], %s1409_s21 }
  0x75   : > { %s344_s18 = sand.u32 1, %s2163_s12  }
  0x76   : > { %s345_s19 = scalar_lea.sflag [#allocation9], %s344_s18 }
  0x77   : > { %1607 = dma.done.wait (%p2162_p11), %s345_s19, 2560  }
  0x78   : > { %1609 = vsyncadd (%p2162_p11), %s345_s19, 4294964736  ;;  %s1411_s17 = sshll.u32 %s335_s0, 5  ;;  %v570_v11 = vld [vmem:[%s1862_s30 + $0x40] sm:$0xff]  ;;  %v571_v16 = vld [vmem:[%s1862_s30 + $0x48] sm:$0xff]  ;;  %p428_p9 = scmp.lt.s32.totalorder %s1624_s24, 1  ;;  %vm913_vm0 = vcmask 0  }
  0x79   : > { %s1876_s13 = scalar_lea.vmem [#allocation10], %s1411_s17  ;;  %v586_v17 = vld [vmem:[%s1870_s20 + $0x40] sm:$0xff]  ;;  %v587_v18 = vld [vmem:[%s1870_s20 + $0x48] sm:$0xff]  ;;  %v572_v23 = vld [vmem:[%s1862_s30 + $0x50] sm:$0xff] }
  0x7a   : > { %v527_v0 = vld [vmem:[%s1876_s13 + $0x8] sm:$0xff]  ;;  %v526_v1 = vld [vmem:[%s1876_s13] sm:$0xff]  ;;  %v528_v10 = vld [vmem:[%s1876_s13 + $0x10] sm:$0xff]  ;;  %v602_v33 = vsub.f32 %v570_v11, %v586_v17  ;;  %v603_v34 = vsub.f32 %v571_v16, %v587_v18  ;;  %s2174_s24 = smov (!%p428_p9, %s1624_s24), 1 }
  0x7b   : > { %v534_v2 = vunpack.c.0.s8 %v527_v0  ;;  %v535_v3 = vunpack.c.1.s8 %v527_v0  ;;  %v536_v4 = vunpack.c.2.s8 %v527_v0  ;;  %v537_v5 = vunpack.c.3.s8 %v527_v0  ;;  %v573_v28 = vld [vmem:[%s1862_s30 + $0x58] sm:$0xff]  ;;  %v588_v29 = vld [vmem:[%s1870_s20 + $0x50] sm:$0xff]  ;;  %v562_v35 = vld [vmem:[%s1862_s30] sm:$0xff]  ;;  %s1412_s7 = sshll.u32 %s2174_s24, 2 }
  0x7c   : > { %v530_v6 = vunpack.c.0.s8 %v526_v1  ;;  %v531_v7 = vunpack.c.1.s8 %v526_v1  ;;  %v532_v8 = vunpack.c.2.s8 %v526_v1  ;;  %v533_v9 = vunpack.c.3.s8 %v526_v1  ;;  %v589_v30 = vld [vmem:[%s1870_s20 + $0x58] sm:$0xff]  ;;  %v578_v36 = vld [vmem:[%s1870_s20] sm:$0xff]  ;;  %v563_v41 = vld [vmem:[%s1862_s30 + $0x8] sm:$0xff]  ;;  %s2087_s10 = scalar_lea.vmem %s2142_s6, %s1412_s7  ;;  %s433_s16 = scalar_lea.vmem %s2139_s3, %s1412_s7 }
  0x7d   : > { %v1882_v12 = vcvt.s32.f32 %v534_v2  ;;  %v1884_v13 = vcvt.s32.f32 %v535_v3  ;;  %v1886_v14 = vcvt.s32.f32 %v536_v4  ;;  %v1888_v15 = vcvt.s32.f32 %v537_v5  ;;  %v564_v42 = vld [vmem:[%s1862_s30 + $0x10] sm:$0xff]  ;;  %v579_v43 = vld [vmem:[%s1870_s20 + $0x8] sm:$0xff]  ;;  %v565_v48 = vld [vmem:[%s1862_s30 + $0x18] sm:$0xff]  ;;  %s441_s15 = scalar_lea.vmem %s2140_s4, %s1412_s7  ;;  %s449_s27 = scalar_lea.vmem %s2141_s5, %s1412_s7 }
  0x7e   : > { %v1893_v19 = vcvt.s32.f32 %v530_v6  ;;  %v1895_v20 = vcvt.s32.f32 %v531_v7  ;;  %v1897_v21 = vcvt.s32.f32 %v532_v8  ;;  %v1899_v22 = vcvt.s32.f32 %v533_v9  ;;  %v580_v49 = vld [vmem:[%s1870_s20 + $0x10] sm:$0xff]  ;;  %v581_v50 = vld [vmem:[%s1870_s20 + $0x18] sm:$0xff]  ;;  %v574_v16 = vld [vmem:[%s1862_s30 + $0x60] sm:$0xff] }
  0x7f   : > { %v1071_v24 = vadd.f32 %v1884_v13, %v1882_v12  ;;  %v538_v25 = vunpack.c.0.s8 %v528_v10  ;;  %v539_v26 = vunpack.c.1.s8 %v528_v10  ;;  %v540_v27 = vunpack.c.2.s8 %v528_v10  ;;  %v529_v55 = vld [vmem:[%s1876_s13 + $0x18] sm:$0xff]  ;;  %v575_v17 = vld [vmem:[%s1862_s30 + $0x68] sm:$0xff]  ;;  %v590_v18 = vld [vmem:[%s1870_s20 + $0x60] sm:$0xff] }
  0x80   : > { %v1062_v31 = vadd.f32 %v1895_v20, %v1893_v19  ;;  %v541_v32 = vunpack.c.3.s8 %v528_v10  ;;  %v604_v46 = vsub.f32 %v572_v23, %v588_v29  ;;  %v605_v47 = vsub.f32 %v573_v28, %v589_v30  ;;  %v591_v28 = vld [vmem:[%s1870_s20 + $0x68] sm:$0xff]  ;;  %v592_v29 = vld [vmem:[%s1870_s20 + $0x70] sm:$0xff] }
  0x81   : > { %v1072_v37 = vadd.f32 %v1071_v24, %v1886_v14  ;;  %v1912_v38 = vcvt.s32.f32 %v538_v25  ;;  %v1914_v39 = vcvt.s32.f32 %v539_v26  ;;  %v1916_v40 = vcvt.s32.f32 %v540_v27  ;;  %v576_v27 = vld [vmem:[%s1862_s30 + $0x70] sm:$0xff] }
  0x82   : > { %v1063_v44 = vadd.f32 %v1062_v31, %v1897_v21  ;;  %v1922_v45 = vcvt.s32.f32 %v541_v32  ;;  %v594_v54 = vsub.f32 %v562_v35, %v578_v36  ;;  %v595_v59 = vsub.f32 %v563_v41, %v579_v43  ;;  %v593_v35 = vld [vmem:[%s1870_s20 + $0x78] sm:$0xff] }
  0x83   : > { %v1073_v51 = vadd.f32 %v1072_v37, %v1888_v15  ;;  %v1929_v52 = vmul.f32 %v602_v33, %v1912_v38  ;;  %v1932_v53 = vmul.f32 %v603_v34, %v1914_v39  ;;  %v1937_v57 = vmul.f32 %v604_v46, %v1916_v40  ;;  %v577_v34 = vld [vmem:[%s1862_s30 + $0x78] sm:$0xff] }
  0x84   : > { %2164 = vst [vmem:[#allocation13_spill] sm:$0xff] %v1922_v45  ;;  %v1064_v56 = vadd.f32 %v1063_v44, %v1899_v22  ;;  %v1940_v58 = vmul.f32 %v605_v47, %v1922_v45  ;;  %v596_v62 = vsub.f32 %v564_v42, %v580_v49  ;;  %v597_v63 = vsub.f32 %v565_v48, %v581_v50  ;;  %v566_v48 = vld [vmem:[%s1862_s30 + $0x20] sm:$0xff] }
  0x85   : > { %v1074_v60 = vrot.slane %v1073_v51, 4  ;;  %v887_v61 = vadd.f32 %v1932_v53, %v1929_v52  ;;  %v1945_v1 = vmul.f32 %v594_v54, %v1893_v19  ;;  %v1948_v2 = vmul.f32 %v595_v59, %v1895_v20  ;;  %v582_v49 = vld [vmem:[%s1870_s20 + $0x20] sm:$0xff]  ;;  %v568_v59 = vld [vmem:[%s1862_s30 + $0x30] sm:$0xff] }
  0x86   : > { %v1065_v0 = vrot.slane %v1064_v56, 4  ;;  %v542_v3 = vunpack.c.0.s8 %v529_v55  ;;  %v1952_v6 = vmul.f32 %v596_v62, %v1897_v21  ;;  %v1955_v7 = vmul.f32 %v597_v63, %v1899_v22 }
  0x87   : > { %v1075_v4 = vadd.f32 %v1074_v60, %v1073_v51  ;;  %v888_v5 = vadd.f32 %v887_v61, %v1937_v57  ;;  %v869_v9 = vadd.f32 %v1948_v2, %v1945_v1  ;;  %v543_v10 = vunpack.c.1.s8 %v529_v55  ;;  %v583_v60 = vld [vmem:[%s1870_s20 + $0x28] sm:$0xff] }
  0x88   : > { %v1066_v8 = vadd.f32 %v1065_v0, %v1064_v56  ;;  %v544_v11 = vunpack.c.2.s8 %v529_v55  ;;  %v545_v25 = vunpack.c.3.s8 %v529_v55  ;;  %v1963_v26 = vcvt.s32.f32 %v542_v3  ;;  %v567_v56 = vld [vmem:[%s1862_s30 + $0x28] sm:$0xff]  ;;  %v569_v3 = vld [vmem:[%s1862_s30 + $0x38] sm:$0xff] }
  0x89   : > { %v1076_v23 = vrot.slane %v1075_v4, 2  ;;  %v889_v24 = vadd.f32 %v888_v5, %v1940_v58  ;;  %v870_v31 = vadd.f32 %v869_v9, %v1952_v6  ;;  %v1969_v32 = vcvt.s32.f32 %v543_v10  ;;  %v585_v5 = vld [vmem:[%s1870_s20 + $0x38] sm:$0xff] }
  0x8a   : > { %v1067_v30 = vrot.slane %v1066_v8, 2  ;;  %v1971_v33 = vcvt.s32.f32 %v544_v11  ;;  %v1975_v41 = vcvt.s32.f32 %v545_v25  ;;  %v606_v42 = vsub.f32 %v574_v16, %v590_v18 }
  0x8b   : > { %v1077_v36 = vadd.f32 %v1076_v23, %v1075_v4  ;;  %v890_v37 = vrot.slane %v889_v24, 4  ;;  %v871_v44 = vadd.f32 %v870_v31, %v1955_v7  ;;  %v607_v46 = vsub.f32 %v575_v17, %v591_v28  ;;  %v584_v4 = vld [vmem:[%s1870_s20 + $0x30] sm:$0xff] }
  0x8c   : > { %v1068_v43 = vadd.f32 %v1067_v30, %v1066_v8  ;;  %v608_v47 = vsub.f32 %v576_v27, %v592_v29  ;;  %v609_v54 = vsub.f32 %v577_v34, %v593_v35  ;;  %v1981_v55 = vmul.f32 %v606_v42, %v1963_v26 }
  0x8d   : > { %v1078_v50 = vrot.slane %v1077_v36, 1  ;;  %v891_v51 = vadd.f32 %v890_v37, %v889_v24  ;;  %v872_v62 = vrot.slane %v871_v44, 4  ;;  %v1987_v63 = vmul.f32 %v607_v46, %v1969_v32 }
  0x8e   : > { %v1069_v61 = vrot.slane %v1068_v43, 1  ;;  %v1990_v0 = vmul.f32 %v608_v47, %v1971_v33  ;;  %v1996_v10 = vmul.f32 %v609_v54, %v1975_v41  ;;  %v598_v11 = vsub.f32 %v566_v48, %v582_v49 }
  0x8f   : > { %v1079_v8 = vadd.f32 %v1078_v50, %v1077_v36  ;;  %v892_v9 = vrot.slane %v891_v51, 2  ;;  %v873_v17 = vadd.f32 %v872_v62, %v871_v44  ;;  %v896_v18 = vadd.f32 %v1987_v63, %v1981_v55 }
  0x90   : > { %v1070_v16 = vadd.f32 %v1069_v61, %v1068_v43  ;;  %v599_v23 = vsub.f32 %v567_v56, %v583_v60  ;;  %v600_v25 = vsub.f32 %v568_v59, %v584_v4  ;;  %v601_v27 = vsub.f32 %v569_v3, %v585_v5 }
  0x91   : > { %1100 = vadd.xlane.f32.xlu1 %v1079_v8  ;;  %v893_v24 = vadd.f32 %v892_v9, %v891_v51  ;;  %v614_v28 = vmul.f32 %v598_v11, %v1882_v12  ;;  %v874_v29 = vrot.slane %v873_v17, 2  ;;  %v897_v30 = vadd.f32 %v896_v18, %v1990_v0 }
  0x92   : > { %1098 = vadd.xlane.f32.xlu0 %v1070_v16  ;;  %v615_v31 = vmul.f32 %v599_v23, %v1884_v13  ;;  %v2005_v34 = vmul.f32 %v1945_v1, %v1893_v19  ;;  %v616_v36 = vmul.f32 %v600_v25, %v1886_v14  ;;  %v617_v37 = vmul.f32 %v601_v27, %v1888_v15 }
  0x93   : > { %v894_v35 = vrot.slane %v893_v24, 1  ;;  %v630_v42 = vmul.f32 %v614_v28, %v1882_v12  ;;  %v875_v43 = vadd.f32 %v874_v29, %v873_v17  ;;  %v898_v44 = vadd.f32 %v897_v30, %v1996_v10 }
  0x94   : > { %v878_v46 = vadd.f32 %v615_v31, %v614_v28  ;;  %v631_v47 = vmul.f32 %v615_v31, %v1884_v13  ;;  %v632_v49 = vmul.f32 %v616_v36, %v1886_v14  ;;  %v633_v50 = vmul.f32 %v617_v37, %v1888_v15 }
  0x95   : > { %v895_v48 = vadd.f32 %v894_v35, %v893_v24  ;;  %v627_v19 = vmul.f32 %v1948_v2, %v1895_v20  ;;  %v876_v51 = vrot.slane %v875_v43, 1  ;;  %v899_v54 = vrot.slane %v898_v44, 4 }
  0x96   : > { %v879_v56 = vadd.f32 %v878_v46, %v616_v36  ;;  %v943_v59 = vadd.f32 %v631_v47, %v630_v42  ;;  %v628_v12 = vmul.f32 %v1952_v6, %v1897_v21  ;;  %v629_v60 = vmul.f32 %v1955_v7, %v1899_v22 }
  0x97   : > { %909 = vadd.xlane.f32.xlu1 %v895_v48  ;;  %v934_v13 = vadd.f32 %v627_v19, %v2005_v34  ;;  %v638_v14 = vmul.f32 %v1981_v55, %v1963_v26  ;;  %v877_v15 = vadd.f32 %v876_v51, %v875_v43  ;;  %v900_v61 = vadd.f32 %v899_v54, %v898_v44 }
  0x98   : > { %v880_v62 = vadd.f32 %v879_v56, %v617_v37  ;;  %v944_v20 = vadd.f32 %v943_v59, %v632_v49  ;;  %v639_v4 = vmul.f32 %v1987_v63, %v1969_v32  ;;  %v2027_v5 = vmul.f32 %v1990_v0, %v1971_v33 }
  0x99   : > { %v935_v3 = vadd.f32 %v934_v13, %v628_v12  ;;  %v2031_v21 = vmul.f32 %v1996_v10, %v1975_v41  ;;  %905 = vadd.xlane.f32.xlu0 %v877_v15  ;;  %v901_v22 = vrot.slane %v900_v61, 2  ;;  %v2035_v11 = vmul.f32 %v1929_v52, %v1912_v38 }
  0x9a   : > { %v881_v8 = vrot.slane %v880_v62, 4  ;;  %v945_v9 = vadd.f32 %v944_v20, %v633_v50  ;;  %v961_v17 = vadd.f32 %v639_v4, %v638_v14  ;;  %v2039_v18 = vmul.f32 %v1932_v53, %v1914_v39 }
  0x9b   : > { %v936_v16 = vadd.f32 %v935_v3, %v629_v60  ;;  %v2043_v23 = vmul.f32 %v1937_v57, %v1916_v40  ;;  %v902_v24 = vadd.f32 %v901_v22, %v900_v61  ;;  %v2047_v29 = vmul.f32 %v1940_v58, %v1922_v45 }
  0x9c   : > { %v882_v25 = vadd.f32 %v881_v8, %v880_v62  ;;  %v946_v27 = vrot.slane %v945_v9, 4  ;;  %v962_v35 = vadd.f32 %v961_v17, %v2027_v5  ;;  %v952_v43 = vadd.f32 %v2039_v18, %v2035_v11 }
  0x9d   : > { %v937_v30 = vrot.slane %v936_v16, 4  ;;  %v758_v44 = vmul.f32 %v630_v42, %v614_v28  ;;  %v903_v46 = vrot.slane %v902_v24, 1  ;;  %v759_v54 = vmul.f32 %v631_v47, %v615_v31 }
  0x9e   : > { %v883_v48 = vrot.slane %v882_v25, 2  ;;  %v947_v51 = vadd.f32 %v946_v27, %v945_v9  ;;  %v963_v59 = vadd.f32 %v962_v35, %v2031_v21  ;;  %v953_v13 = vadd.f32 %v952_v43, %v2043_v23 }
  0x9f   : > { %v938_v56 = vadd.f32 %v937_v30, %v936_v16  ;;  %v760_v15 = vmul.f32 %v632_v49, %v616_v36  ;;  %v904_v61 = vadd.f32 %v903_v46, %v902_v24  ;;  %v761_v3 = vmul.f32 %v633_v50, %v617_v37 }
  0xa0   : > { %v884_v62 = vadd.f32 %v883_v48, %v882_v25  ;;  %v948_v20 = vrot.slane %v947_v51, 2  ;;  %v964_v8 = vrot.slane %v963_v59, 4  ;;  %v954_v17 = vadd.f32 %v953_v13, %v2047_v29 }
  0xa1   : > { %v939_v22 = vrot.slane %v938_v56, 2  ;;  %v1007_v45 = vadd.f32 %v759_v54, %v758_v44  ;;  %911 = vadd.xlane.f32.xlu1 %v904_v61  ;;  %v754_v31 = vmul.f32 %v2005_v34, %v1945_v1  ;;  %v755_v47 = vmul.f32 %v627_v19, %v1948_v2 }
  0xa2   : > { %v885_v28 = vrot.slane %v884_v62, 1  ;;  %v949_v42 = vadd.f32 %v948_v20, %v947_v51  ;;  %v965_v16 = vadd.f32 %v964_v8, %v963_v59  ;;  %v955_v36 = vrot.slane %v954_v17, 4 }
  0xa3   : > { %v940_v9 = vadd.f32 %v939_v22, %v938_v56  ;;  %v1008_v49 = vadd.f32 %v1007_v45, %v760_v15  ;;  %v756_v37 = vmul.f32 %v628_v12, %v1952_v6  ;;  %v757_v50 = vmul.f32 %v629_v60, %v1955_v7 }
  0xa4   : > { %v886_v24 = vadd.f32 %v885_v28, %v884_v62  ;;  %v950_v25 = vrot.slane %v949_v42, 1  ;;  %v966_v30 = vrot.slane %v965_v16, 2  ;;  %v956_v35 = vadd.f32 %v955_v36, %v954_v17  ;;  %v2165_v17 = vld [vmem:[#allocation13_spill] sm:$0xff] }
  0xa5   : > { %v941_v27 = vrot.slane %v940_v9, 1  ;;  %v1009_v43 = vadd.f32 %v1008_v49, %v761_v3  ;;  %v998_v46 = vadd.f32 %v755_v47, %v754_v31  ;;  %v766_v1 = vmul.f32 %v638_v14, %v1981_v55 }
  0xa6   : > { %907 = vadd.xlane.f32.xlu0 %v886_v24  ;;  %v951_v44 = vadd.f32 %v950_v25, %v949_v42  ;;  %v767_v2 = vmul.f32 %v639_v4, %v1987_v63  ;;  %v967_v19 = vadd.f32 %v966_v30, %v965_v16  ;;  %v957_v45 = vrot.slane %v956_v35, 2 }
  0xa7   : > { %v942_v34 = vadd.f32 %v941_v27, %v940_v9  ;;  %v1010_v48 = vrot.slane %v1009_v43, 4  ;;  %v999_v51 = vadd.f32 %v998_v46, %v756_v37  ;;  %v768_v6 = vmul.f32 %v2027_v5, %v1990_v0 }
  0xa8   : > { %972 = vadd.xlane.f32.xlu1 %v951_v44  ;;  %v769_v7 = vmul.f32 %v2031_v21, %v1996_v10  ;;  %v1025_v12 = vadd.f32 %v767_v2, %v766_v1  ;;  %v968_v60 = vrot.slane %v967_v19, 1  ;;  %v958_v54 = vadd.f32 %v957_v45, %v956_v35 }
  0xa9   : > { %v1011_v56 = vadd.f32 %v1010_v48, %v1009_v43  ;;  %v762_v55 = vmul.f32 %v2035_v11, %v1929_v52  ;;  %v1000_v63 = vadd.f32 %v999_v51, %v757_v50  ;;  %v763_v4 = vmul.f32 %v2039_v18, %v1932_v53 }
  0xaa   : > { %970 = vadd.xlane.f32.xlu0 %v942_v34  ;;  %v1026_v14 = vadd.f32 %v1025_v12, %v768_v6  ;;  %v764_v59 = vmul.f32 %v2043_v23, %v1937_v57  ;;  %v969_v0 = vadd.f32 %v968_v60, %v967_v19  ;;  %v959_v5 = vrot.slane %v958_v54, 1 }
  0xab   : > { %v1012_v13 = vrot.slane %v1011_v56, 2  ;;  %v765_v10 = vmul.f32 %v2047_v29, %v1940_v58  ;;  %v1001_v21 = vrot.slane %v1000_v63, 4  ;;  %v1016_v61 = vadd.f32 %v763_v4, %v762_v55 }
  0xac   : > { %v1027_v15 = vadd.f32 %v1026_v14, %v769_v7  ;;  %v1089_v52 = vadd.f32 %v1969_v32, %v1963_v26  ;;  %976 = vadd.xlane.f32.xlu1 %v969_v0  ;;  %v960_v11 = vadd.f32 %v959_v5, %v958_v54  ;;  %v1080_v53 = vadd.f32 %v1914_v39, %v1912_v38 }
  0xad   : > { %v1013_v62 = vadd.f32 %v1012_v13, %v1011_v56  ;;  %v1002_v18 = vadd.f32 %v1001_v21, %v1000_v63  ;;  %v1017_v23 = vadd.f32 %v1016_v61, %v764_v59 }
  0xae   : > { %v1028_v57 = vrot.slane %v1027_v15, 4  ;;  %v1090_v20 = vadd.f32 %v1089_v52, %v1971_v33  ;;  %974 = vadd.xlane.f32.xlu0 %v960_v11  ;;  %v1081_v58 = vadd.f32 %v1080_v53, %v1916_v40 }
  0xaf   : > { %v1014_v3 = vrot.slane %v1013_v62, 1  ;;  %v1003_v29 = vrot.slane %v1002_v18, 2  ;;  %v1018_v8 = vadd.f32 %v1017_v23, %v765_v10 }
  0xb0   : > { %v1029_v22 = vadd.f32 %v1028_v57, %v1027_v15  ;;  %v1091_v26 = vadd.f32 %v1090_v20, %v1975_v41  ;;  %v1082_v28 = vadd.f32 %v1081_v58, %v2165_v17 }
  0xb1   : > { %v1015_v32 = vadd.f32 %v1014_v3, %v1013_v62  ;;  %v1004_v42 = vadd.f32 %v1003_v29, %v1002_v18  ;;  %v1019_v38 = vrot.slane %v1018_v8, 4 }
  0xb2   : > { %v1030_v31 = vrot.slane %v1029_v22, 2  ;;  %v1092_v39 = vrot.slane %v1091_v26, 4  ;;  %v1083_v47 = vrot.slane %v1082_v28, 4 }
  0xb3   : > { %1036 = vadd.xlane.f32.xlu1 %v1015_v32  ;;  %v1005_v9 = vrot.slane %v1004_v42, 1  ;;  %v1020_v16 = vadd.f32 %v1019_v38, %v1018_v8 }
  0xb4   : > { %v1031_v33 = vadd.f32 %v1030_v31, %v1029_v22  ;;  %v1093_v36 = vadd.f32 %v1092_v39, %v1091_v26  ;;  %v1084_v49 = vadd.f32 %v1083_v47, %v1082_v28 }
  0xb5   : > { %v1006_v40 = vadd.f32 %v1005_v9, %v1004_v42  ;;  %v1021_v25 = vrot.slane %v1020_v16, 2 }
  0xb6   : > { %v1032_v24 = vrot.slane %v1031_v33, 1  ;;  %v1094_v37 = vrot.slane %v1093_v36, 2  ;;  %v1085_v50 = vrot.slane %v1084_v49, 2 }
  0xb7   : > { %1034 = vadd.xlane.f32.xlu0 %v1006_v40  ;;  %v1022_v27 = vadd.f32 %v1021_v25, %v1020_v16 }
  0xb8   : > { %v1033_v41 = vadd.f32 %v1032_v24, %v1031_v33  ;;  %v1095_v30 = vadd.f32 %v1094_v37, %v1093_v36  ;;  %v1086_v35 = vadd.f32 %v1085_v50, %v1084_v49 }
  0xb9   : > { %v1023_v43 = vrot.slane %v1022_v27, 1 }
  0xba   : > { %1040 = vadd.xlane.f32.xlu1 %v1033_v41  ;;  %v1096_v44 = vrot.slane %v1095_v30, 1  ;;  %v1087_v46 = vrot.slane %v1086_v35, 1 }
  0xbb   : > { %v1024_v1 = vadd.f32 %v1023_v43, %v1022_v27 }
  0xbc   : > { %v1097_v2 = vadd.f32 %v1096_v44, %v1095_v30  ;;  %v1088_v34 = vadd.f32 %v1087_v46, %v1086_v35 }
  0xbd   : > { %1038 = vadd.xlane.f32.xlu0 %v1024_v1 }
  0xbe   : > { %1104 = vadd.xlane.f32.xlu1 %v1097_v2 }
  0xc1   : > { %1102 = vadd.xlane.f32.xlu0 %v1088_v34 }
 0x11e   : > { %v1101_v19 = vpop.xlane.xlu1 %1100 }
 0x11f   : > { %1107 = vst.msk [vmem:[%s2087_s10 + $0x1] sm:$0x1] %vm913_vm0, %v1101_v19  ;;  %v1099_v45 = vpop.xlane.xlu0 %1098 }
 0x120   : > { %1106 = vst.msk [vmem:[%s2087_s10] sm:$0x1] %vm913_vm0, %v1099_v45 }
 0x124   : > { %v910_v48 = vpop.xlane.xlu1 %909 }
 0x125   : > { %916 = vst.msk [vmem:[%s433_s16 + $0x2] sm:$0x1] %vm913_vm0, %v910_v48 }
 0x126   : > { %v906_v51 = vpop.xlane.xlu0 %905 }
 0x127   : > { %914 = vst.msk [vmem:[%s433_s16] sm:$0x1] %vm913_vm0, %v906_v51 }
 0x12e   : > { %v912_v6 = vpop.xlane.xlu1 %911 }
 0x12f   : > { %917 = vst.msk [vmem:[%s433_s16 + $0x3] sm:$0x1] %vm913_vm0, %v912_v6 }
 0x133   : > { %v908_v7 = vpop.xlane.xlu0 %907 }
 0x134   : > { %915 = vst.msk [vmem:[%s433_s16 + $0x1] sm:$0x1] %vm913_vm0, %v908_v7 }
 0x135   : > { %v973_v12 = vpop.xlane.xlu1 %972 }
 0x136   : > { %979 = vst.msk [vmem:[%s441_s15 + $0x1] sm:$0x1] %vm913_vm0, %v973_v12 }
 0x137   : > { %v971_v60 = vpop.xlane.xlu0 %970 }
 0x138   : > { %978 = vst.msk [vmem:[%s441_s15] sm:$0x1] %vm913_vm0, %v971_v60 }
 0x139   : > { %v977_v54 = vpop.xlane.xlu1 %976 }
 0x13a   : > { %981 = vst.msk [vmem:[%s441_s15 + $0x3] sm:$0x1] %vm913_vm0, %v977_v54 }
 0x13b   : > { %v975_v56 = vpop.xlane.xlu0 %974 }
 0x13c   : > { %980 = vst.msk [vmem:[%s441_s15 + $0x2] sm:$0x1] %vm913_vm0, %v975_v56 }
 0x140   : > { %v1037_v55 = vpop.xlane.xlu1 %1036 }
 0x141   : > { %1043 = vst.msk [vmem:[%s449_s27 + $0x1] sm:$0x1] %vm913_vm0, %v1037_v55 }
 0x144   : > { %v1035_v63 = vpop.xlane.xlu0 %1034 }
 0x145   : > { %1042 = vst.msk [vmem:[%s449_s27] sm:$0x1] %vm913_vm0, %v1035_v63 }
 0x147   : > { %v1041_v14 = vpop.xlane.xlu1 %1040 }
 0x148   : > { %1045 = vst.msk [vmem:[%s449_s27 + $0x3] sm:$0x1] %vm913_vm0, %v1041_v14 }
 0x14a   : > { %v1039_v4 = vpop.xlane.xlu0 %1038 }
 0x14b   : > { %v1105_v59 = vpop.xlane.xlu1 %1104  ;;  %1044 = vst.msk [vmem:[%s449_s27 + $0x2] sm:$0x1] %vm913_vm0, %v1039_v4 }
 0x14c   : > { %1109 = vst.msk [vmem:[%s2087_s10 + $0x3] sm:$0x1] %vm913_vm0, %v1105_v59 }
 0x14e   : > { %v1103_v0 = vpop.xlane.xlu0 %1102 }
 0x14f   : > { %1108 = vst.msk [vmem:[%s2087_s10 + $0x2] sm:$0x1] %vm913_vm0, %v1103_v0 }
 0x150 PF: > { %s23_s26 = sadd.s32 1, %s1632_s26   ;;  %s2166_s21 = smov %s1616_s22 }
 0x151   : > { %p20_p2 = scmp.ge.s32.totalorder %s23_s26, 4   ;;  %s2167_s22 = smov %s1620_s23 }
 0x152   : > { %s2168_s23 = smov %s1721_s8  ;;  %s2169_s24 = smov %s1628_s25 }
 0x153   : > { %s2170_s25 = smov %s2172_s28  ;;  %22 = sbr.rel (!%p20_p2) target bundleno = 9 (0x9), region = 140 }
 0x15a   :  { %1203 = vsyncpa [#allocation7], 1 }
 0x15b   :  { %1205 = vsyncpa [#allocation7 + $0x1], 1 }
 0x15c   :  { %1206 = vsyncpa [#allocation9], 1 }
 0x15d   :  { %1208 = vsyncpa [#allocation9 + $0x1], 1 }

</bundles_post_ra>
